<compile_context>
chip_gen: v5e
topology: v5e:2x2
jax: 0.10.0
libtpu: 0.0.40
codegen_flags: <defaults>
</compile_context>

<pallas_src>
import math
import functools

import jax
import jax.numpy as jnp
from jax import lax
from jax.experimental import pallas as pl
from jax.experimental.pallas import tpu as pltpu


# ----------------------------- helpers --------------------------------------


def _round_up(v, m):
    return ((v + m - 1) // m) * m


def _device_kind():
    try:
        return jax.devices()[0].device_kind.lower()
    except Exception:
        return ""


def _vmem_cap_bytes(kind):
    try:
        cap = int(pltpu.get_tpu_info().vmem_capacity_bytes)
        if cap > 0:
            return cap
    except Exception:
        pass
    return (64 << 20) if "v7" in kind else (128 << 20)


def _default_tiles(kind):
    # v5e is already compute-bound at tm=256; v6e/v7x need larger row tiles to
    # amortize the W_fc/W_proj HBM stream.
    if "v5" in kind:
        return 256, 512
    return 512, 512


def _pick_tm(M, tm_target):
    tm_target = max(8, _round_up(tm_target, 8))
    M8 = _round_up(M, 8)
    if M8 <= tm_target:
        return M8                       # single tile, minimal padding
    if M % tm_target == 0:
        return tm_target
    # Prefer a divisor of M (multiple of 8) to avoid pad + slice HBM passes,
    # but not so small that MXU occupancy collapses.
    cand = tm_target - 8
    floor = max(128, tm_target // 2)
    while cand >= floor:
        if M % cand == 0:
            return cand
        cand -= 8
    return tm_target                    # accept padding the last m block


def _pick_tk(inter_pad, tk_target):
    # inter_pad is always a multiple of 128, so this terminates at tk >= 128.
    tk = max(128, min((tk_target // 128) * 128, inter_pad))
    while inter_pad % tk:
        tk -= 128
    return tk


def _vmem_estimate(tm, tk, n_embd, cd, od, use_scratch):
    # Worst-case (everything double-buffered) so the limit is valid whether or
    # not the Buffered(1) trim is applied.
    return (2 * tm * n_embd * cd                       # x
            + 2 * (n_embd * tk + tk * n_embd) * cd     # W_fc + W_proj slices
            + 2 * (tk + n_embd) * 4                    # biases (f32)
            + 2 * tm * n_embd * od                     # output
            + (tm * n_embd * 4 if use_scratch else 0)  # f32 accumulator
            )


def _gelu(x, approximate):
    if approximate == "tanh":
        c = math.sqrt(2.0 / math.pi)
        return 0.5 * x * (1.0 + jnp.tanh(c * (x + 0.044715 * x * x * x)))
    # exact GELU (lit_gpt default, gelu_approximate="none")
    return 0.5 * x * (1.0 + lax.erf(x * (1.0 / math.sqrt(2.0))))


# ----------------------------- kernel ----------------------------------------


def gptneox_mlp_kernel(x_ref, wfc_ref, bfc_ref, wproj_ref, bproj_ref, o_ref,
                       *scratch, approximate):
    # Accumulate into the f32 scratch if present, otherwise directly into o_ref
    # (only chosen when the output dtype is f32).
    acc_ref = scratch[0] if scratch else o_ref
    k = pl.program_id(1)

    @pl.when(k == 0)
    def _():
        acc_ref[...] = jnp.zeros_like(acc_ref)

    # fc slice: (tm, n_embd) @ (n_embd, tk) -> (tm, tk), f32 accumulation on MXU
    h = jnp.dot(x_ref[...], wfc_ref[...], preferred_element_type=jnp.float32)
    h = _gelu(h + bfc_ref[...], approximate)          # f32 bias + GELU epilogue

    # proj slice: (tm, tk) @ (tk, n_embd) -> accumulate (tm, n_embd) in f32
    acc_ref[...] += jnp.dot(h.astype(wproj_ref.dtype), wproj_ref[...],
                            preferred_element_type=jnp.float32)

    @pl.when(k == pl.num_programs(1) - 1)
    def _():
        o_ref[...] = (acc_ref[...] + bproj_ref[...]).astype(o_ref.dtype)


# ----------------------------- wrappers ---------------------------------------


def prepare_gptneox_mlp_params(w_fc, b_fc, w_proj, b_proj, *,
                               compute_dtype=jnp.bfloat16):
    """Cast weights to the MXU operand dtype and zero-pad the intermediate dim to
    a multiple of 128.  Call ONCE per model and reuse across steps so the casts /
    pads do not re-stream the f32 weights from HBM on every forward call.

    w_fc: (n_embd, inter) stored (in, out);  b_fc: (inter,) or None;
    w_proj: (inter, n_embd);  b_proj: (n_embd,) or None."""
    n_embd, inter = w_fc.shape
    assert w_proj.shape == (inter, n_embd)
    inter_pad = _round_up(inter, 128)

    if b_fc is None:
        b_fc = jnp.zeros((inter,), jnp.float32)
    if b_proj is None:
        b_proj = jnp.zeros((n_embd,), jnp.float32)

    w_fc_c = w_fc.astype(compute_dtype)
    w_proj_c = w_proj.astype(compute_dtype)
    b_fc_c = b_fc.astype(jnp.float32).reshape(1, inter)
    if inter_pad != inter:
        pad = inter_pad - inter
        w_fc_c = jnp.pad(w_fc_c, ((0, 0), (0, pad)))
        w_proj_c = jnp.pad(w_proj_c, ((0, pad), (0, 0)))   # zero rows: inert
        b_fc_c = jnp.pad(b_fc_c, ((0, 0), (0, pad)))
    b_proj_c = b_proj.astype(jnp.float32).reshape(1, n_embd)

    return {"w_fc": w_fc_c, "b_fc": b_fc_c, "w_proj": w_proj_c,
            "b_proj": b_proj_c, "n_embd": n_embd, "inter": inter,
            "inter_pad": inter_pad}


def gptneox_mlp(x, params, *, tm=None, tk=None, gelu_approximate="none"):
    """x: (B, T, n_embd); params from prepare_gptneox_mlp_params()."""
    B, T, n_embd = x.shape
    assert n_embd == params["n_embd"]
    inter_pad = params["inter_pad"]
    compute_dtype = params["w_fc"].dtype
    out_dtype = x.dtype
    M = B * T

    kind = _device_kind()
    tm_target, tk_target = _default_tiles(kind)
    if tm is not None:
        tm_target = tm
    if tk is not None:
        tk_target = tk

    tm = _pick_tm(M, tm_target)
    # v7x has two TensorCores: make sure the "parallel" m axis has >= 2 blocks.
    M8 = _round_up(M, 8)
    if "v7" in kind and pl.cdiv(M, tm) < 2 and M8 > 8:
        tm = _round_up(pl.cdiv(M8, 2), 8)
    tk = _pick_tk(inter_pad, tk_target)

    use_scratch = jnp.dtype(out_dtype) != jnp.dtype(jnp.float32)
    cd = jnp.dtype(compute_dtype).itemsize
    od = jnp.dtype(out_dtype).itemsize

    vmem_cap = _vmem_cap_bytes(kind)
    budget = vmem_cap - (8 << 20)       # leave headroom for compiler scratch
    # Auto-fit: shrink tk first, then tm, until the estimate fits physical VMEM.
    while _vmem_estimate(tm, tk, n_embd, cd, od, use_scratch) > budget and tk > 128:
        tk = _pick_tk(inter_pad, max(128, tk // 2))
    while _vmem_estimate(tm, tk, n_embd, cd, od, use_scratch) > budget and tm > 8:
        tm = max(8, _round_up(tm // 2, 8))

    m_blocks = pl.cdiv(M, tm)
    M_pad = m_blocks * tm
    k_steps = inter_pad // tk

    x2d = x.reshape(M, n_embd).astype(compute_dtype)
    if M_pad != M:
        x2d = jnp.pad(x2d, ((0, M_pad - M), (0, 0)))

    est = _vmem_estimate(tm, tk, n_embd, cd, od, use_scratch)
    vmem_limit = int(min(max(est * 3 // 2, 32 << 20), budget))

    cost = pl.CostEstimate(
        flops=4 * M_pad * n_embd * inter_pad,
        transcendentals=M_pad * inter_pad,
        bytes_accessed=(M_pad * n_embd * (cd + od)
                        + m_blocks * 2 * n_embd * inter_pad * cd
                        + 4 * (inter_pad + n_embd)))

    kernel = functools.partial(gptneox_mlp_kernel, approximate=gelu_approximate)
    scratch_shapes = [pltpu.VMEM((tm, n_embd), jnp.float32)] if use_scratch else []

    def _specs(trim):
        # x and out keep the same block index for every k step, so a single
        # buffer suffices; weights stream and stay double-buffered.
        kw = dict(pipeline_mode=pl.Buffered(1)) if trim else {}
        in_specs = [
            pl.BlockSpec((tm, n_embd), lambda i, k: (i, 0), **kw),   # x row tile
            pl.BlockSpec((n_embd, tk), lambda i, k: (0, k)),         # W_fc k-slice
            pl.BlockSpec((1, tk), lambda i, k: (0, k)),              # b_fc k-slice
            pl.BlockSpec((tk, n_embd), lambda i, k: (k, 0)),         # W_proj k-slice
            pl.BlockSpec((1, n_embd), lambda i, k: (0, 0)),          # b_proj
        ]
        out_specs = pl.BlockSpec((tm, n_embd), lambda i, k: (i, 0), **kw)
        return in_specs, out_specs

    def _call(trim):
        in_specs, out_specs = _specs(trim)
        return pl.pallas_call(
            kernel,
            out_shape=jax.ShapeDtypeStruct((M_pad, n_embd), out_dtype),
            grid_spec=pltpu.PrefetchScalarGridSpec(
                num_scalar_prefetch=0,
                grid=(m_blocks, k_steps),
                in_specs=in_specs,
                out_specs=out_specs,
                scratch_shapes=scratch_shapes),
            compiler_params=pltpu.CompilerParams(
                dimension_semantics=("parallel", "arbitrary"),
                vmem_limit_bytes=vmem_limit),
            cost_estimate=cost,
        )(x2d, params["w_fc"], params["b_fc"], params["w_proj"], params["b_proj"])

    try:
        out2d = _call(True)     # trimmed buffering on the k-revisited x / out
    except Exception:
        out2d = _call(False)    # fall back to default double buffering

    if M_pad != M:
        out2d = out2d[:M]
    return out2d.reshape(B, T, n_embd)


def reference_mlp(x, w_fc, b_fc, w_proj, b_proj, approximate="none"):
    h = jnp.einsum("btd,df->btf", x, w_fc) + b_fc
    h = _gelu(h, approximate)
    return jnp.einsum("btf,fd->btd", h, w_proj) + b_proj


# ----------------------------- test -------------------------------------------


if __name__ == "__main__":
    # Small GptNeoxMLP config: n_embd=128, intermediate_size=512, bias=True.
    B, T, n_embd, inter = 2, 8, 128, 512

    key = jax.random.PRNGKey(0)
    kx, kw1, kb1, kw2, kb2 = jax.random.split(key, 5)

    x = jax.random.normal(kx, (B, T, n_embd), dtype=jnp.float32)
    # nn.Linear weights stored pre-transposed as (in_features, out_features).
    w_fc = jax.random.normal(kw1, (n_embd, inter), dtype=jnp.float32) * (1.0 / math.sqrt(n_embd))
    b_fc = jax.random.normal(kb1, (inter,), dtype=jnp.float32) * 0.02
    w_proj = jax.random.normal(kw2, (inter, n_embd), dtype=jnp.float32) * (1.0 / math.sqrt(inter))
    b_proj = jax.random.normal(kb2, (n_embd,), dtype=jnp.float32) * 0.02

    ref = reference_mlp(x, w_fc, b_fc, w_proj, b_proj)

    # 1) f32 operand path (tight check); accumulates directly into the f32 output.
    params_f32 = prepare_gptneox_mlp_params(w_fc, b_fc, w_proj, b_proj,
                                            compute_dtype=jnp.float32)
    out_f32 = jax.block_until_ready(gptneox_mlp(x, params_f32, tm=128, tk=128))
    assert out_f32.shape == (B, T, n_embd)
    assert jnp.allclose(out_f32, ref, atol=2e-3, rtol=2e-3), "f32 mismatch vs reference"

    # 2) bf16 weights (prepared once), f32 activations/output — default tiling.
    params_bf16 = prepare_gptneox_mlp_params(w_fc, b_fc, w_proj, b_proj,
                                             compute_dtype=jnp.bfloat16)
    out_bf16 = jax.block_until_ready(gptneox_mlp(x, params_bf16))
    assert out_bf16.shape == (B, T, n_embd)
    assert jnp.allclose(out_bf16, ref, atol=5e-2, rtol=5e-2), "bf16-weight mismatch vs reference"

    # 3) bf16 activations + bf16 output — exercises the f32 scratch accumulator path.
    out_bf16b = jax.block_until_ready(gptneox_mlp(x.astype(jnp.bfloat16), params_bf16))
    assert out_bf16b.dtype == jnp.bfloat16
    assert jnp.allclose(out_bf16b.astype(jnp.float32), ref, atol=1e-1, rtol=1e-1), \
        "bf16 output mismatch vs reference"

    print("KERNEL_OK")
</pallas_src>

<mosaic_0001>
module attributes {stable_mosaic.version = 11 : i64} {
  func.func @gptneox_mlp_kernel(%arg0: i32, %arg1: i32, %arg2: memref<16x128xf32, #tpu.memory_space<vmem>>, %arg3: memref<128x128xf32, #tpu.memory_space<vmem>>, %arg4: memref<1x128xf32, #tpu.memory_space<vmem>>, %arg5: memref<128x128xf32, #tpu.memory_space<vmem>>, %arg6: memref<1x128xf32, #tpu.memory_space<vmem>>, %arg7: memref<16x128xf32, #tpu.memory_space<vmem>>) attributes {dimension_semantics = [#tpu.dimension_semantics<parallel>, #tpu.dimension_semantics<arbitrary>], iteration_bounds = array<i64: 1, 4>, scalar_prefetch = 0 : i64, scratch_operands = 0 : i64, tpu.core_type = #tpu.core_type<tc>, window_params = [{pipeline_mode = #tpu.pipeline_mode<synchronous>, transform_indices = @transform_0, window_bounds = array<i64: 16, 128>}, {transform_indices = @transform_1, window_bounds = array<i64: 128, 128>}, {transform_indices = @transform_2, window_bounds = array<i64: 1, 128>}, {transform_indices = @transform_3, window_bounds = array<i64: 128, 128>}, {pipeline_mode = #tpu.pipeline_mode<synchronous>, transform_indices = @transform_4, window_bounds = array<i64: 1, 128>}, {pipeline_mode = #tpu.pipeline_mode<synchronous>, transform_indices = @transform_5, window_bounds = array<i64: 16, 128>}]} {
    %c0_i32 = arith.constant 0 : i32
    %0 = arith.cmpi eq, %arg1, %c0_i32 : i32
    %1 = arith.extui %0 : i1 to i32
    %c0_i32_0 = arith.constant 0 : i32
    %2 = arith.cmpi ne, %1, %c0_i32_0 : i32
    scf.if %2 {
      %cst_17 = arith.constant 0.000000e+00 : f32
      %25 = vector.broadcast %cst_17 : f32 to vector<16x128xf32>
      %c0_18 = arith.constant 0 : index
      %c0_19 = arith.constant 0 : index
      %26 = vector.load %arg7[%c0_18, %c0_19] : memref<16x128xf32, #tpu.memory_space<vmem>>, vector<16x128xf32>
      tpu.vector_store %arg7[%c0_18, %c0_19], %25 {strides = array<i32>} : memref<16x128xf32, #tpu.memory_space<vmem>>, vector<16x128xf32>,
    } else {
    }
    %c0 = arith.constant 0 : index
    %c0_1 = arith.constant 0 : index
    %3 = vector.load %arg2[%c0, %c0_1] : memref<16x128xf32, #tpu.memory_space<vmem>>, vector<16x128xf32>
    %c0_2 = arith.constant 0 : index
    %c0_3 = arith.constant 0 : index
    %4 = vector.load %arg3[%c0_2, %c0_3] : memref<128x128xf32, #tpu.memory_space<vmem>>, vector<128x128xf32>
    %cst = arith.constant dense<0.000000e+00> : vector<16x128xf32>
    %5 = tpu.matmul %3, %4, %cst {dimension_numbers = #tpu.dot_dimension_numbers<[1], [0], [0], [1], [0, 0, 1, 1], [], []>} : vector<16x128xf32>, vector<128x128xf32>, vector<16x128xf32> -> vector<16x128xf32>
    %c0_4 = arith.constant 0 : index
    %c0_5 = arith.constant 0 : index
    %6 = vector.load %arg4[%c0_4, %c0_5] : memref<1x128xf32, #tpu.memory_space<vmem>>, vector<1x128xf32>
    %7 = vector.broadcast %6 : vector<1x128xf32> to vector<16x128xf32>
    %8 = arith.addf %5, %7 : vector<16x128xf32>
    %cst_6 = arith.constant 5.000000e-01 : f32
    %9 = vector.broadcast %cst_6 : f32 to vector<16x128xf32>
    %10 = arith.mulf %9, %8 : vector<16x128xf32>
    %cst_7 = arith.constant 0.707106769 : f32
    %11 = vector.broadcast %cst_7 : f32 to vector<16x128xf32>
    %12 = arith.mulf %8, %11 : vector<16x128xf32>
    %13 = math.erf %12 : vector<16x128xf32>
    %cst_8 = arith.constant 1.000000e+00 : f32
    %14 = vector.broadcast %cst_8 : f32 to vector<16x128xf32>
    %15 = arith.addf %14, %13 : vector<16x128xf32>
    %16 = arith.mulf %10, %15 : vector<16x128xf32>
    %c0_9 = arith.constant 0 : index
    %c0_10 = arith.constant 0 : index
    %17 = vector.load %arg7[%c0_9, %c0_10] : memref<16x128xf32, #tpu.memory_space<vmem>>, vector<16x128xf32>
    %c0_11 = arith.constant 0 : index
    %c0_12 = arith.constant 0 : index
    %18 = vector.load %arg5[%c0_11, %c0_12] : memref<128x128xf32, #tpu.memory_space<vmem>>, vector<128x128xf32>
    %cst_13 = arith.constant dense<0.000000e+00> : vector<16x128xf32>
    %19 = tpu.matmul %16, %18, %cst_13 {dimension_numbers = #tpu.dot_dimension_numbers<[1], [0], [0], [1], [0, 0, 1, 1], [], []>} : vector<16x128xf32>, vector<128x128xf32>, vector<16x128xf32> -> vector<16x128xf32>
    %20 = arith.addf %17, %19 : vector<16x128xf32>
    %c0_14 = arith.constant 0 : index
    %c0_15 = arith.constant 0 : index
    %21 = vector.load %arg7[%c0_14, %c0_15] : memref<16x128xf32, #tpu.memory_space<vmem>>, vector<16x128xf32>
    tpu.vector_store %arg7[%c0_14, %c0_15], %20 {strides = array<i32>} : memref<16x128xf32, #tpu.memory_space<vmem>>, vector<16x128xf32>,
    %c3_i32 = arith.constant 3 : i32
    %22 = arith.cmpi eq, %arg1, %c3_i32 : i32
    %23 = arith.extui %22 : i1 to i32
    %c0_i32_16 = arith.constant 0 : i32
    %24 = arith.cmpi ne, %23, %c0_i32_16 : i32
    scf.if %24 {
      %c0_17 = arith.constant 0 : index
      %c0_18 = arith.constant 0 : index
      %25 = vector.load %arg7[%c0_17, %c0_18] : memref<16x128xf32, #tpu.memory_space<vmem>>, vector<16x128xf32>
      %c0_19 = arith.constant 0 : index
      %c0_20 = arith.constant 0 : index
      %26 = vector.load %arg6[%c0_19, %c0_20] : memref<1x128xf32, #tpu.memory_space<vmem>>, vector<1x128xf32>
      %27 = vector.broadcast %26 : vector<1x128xf32> to vector<16x128xf32>
      %28 = arith.addf %25, %27 : vector<16x128xf32>
      %c0_21 = arith.constant 0 : index
      %c0_22 = arith.constant 0 : index
      %29 = vector.load %arg7[%c0_21, %c0_22] : memref<16x128xf32, #tpu.memory_space<vmem>>, vector<16x128xf32>
      tpu.vector_store %arg7[%c0_21, %c0_22], %28 {strides = array<i32>} : memref<16x128xf32, #tpu.memory_space<vmem>>, vector<16x128xf32>,
    } else {
    }
    return
  }
  func.func @transform_0(%arg0: i32, %arg1: i32) -> (i32, i32) {
    %c0_i32 = arith.constant 0 : i32
    %c0_i32_0 = arith.constant 0 : i32
    return %arg0, %c0_i32 : i32, i32
  }
  func.func @transform_1(%arg0: i32, %arg1: i32) -> (i32, i32) {
    %c0_i32 = arith.constant 0 : i32
    %c0_i32_0 = arith.constant 0 : i32
    return %c0_i32, %arg1 : i32, i32
  }
  func.func @transform_2(%arg0: i32, %arg1: i32) -> (i32, i32) {
    %c0_i32 = arith.constant 0 : i32
    %c0_i32_0 = arith.constant 0 : i32
    return %c0_i32, %arg1 : i32, i32
  }
  func.func @transform_3(%arg0: i32, %arg1: i32) -> (i32, i32) {
    %c0_i32 = arith.constant 0 : i32
    %c0_i32_0 = arith.constant 0 : i32
    return %arg1, %c0_i32 : i32, i32
  }
  func.func @transform_4(%arg0: i32, %arg1: i32) -> (i32, i32) {
    %c0_i32 = arith.constant 0 : i32
    %c0_i32_0 = arith.constant 0 : i32
    %c0_i32_1 = arith.constant 0 : i32
    return %c0_i32, %c0_i32_0 : i32, i32
  }
  func.func @transform_5(%arg0: i32, %arg1: i32) -> (i32, i32) {
    %c0_i32 = arith.constant 0 : i32
    %c0_i32_0 = arith.constant 0 : i32
    return %arg0, %c0_i32 : i32, i32
  }
}

module attributes {stable_mosaic.version = 11 : i64} {
  func.func @gptneox_mlp_kernel(%arg0: i32, %arg1: i32, %arg2: memref<16x128xf32, #tpu.memory_space<vmem>>, %arg3: memref<128x128xf32, #tpu.memory_space<vmem>>, %arg4: memref<1x128xf32, #tpu.memory_space<vmem>>, %arg5: memref<128x128xf32, #tpu.memory_space<vmem>>, %arg6: memref<1x128xf32, #tpu.memory_space<vmem>>, %arg7: memref<16x128xf32, #tpu.memory_space<vmem>>) attributes {dimension_semantics = [#tpu.dimension_semantics<parallel>, #tpu.dimension_semantics<arbitrary>], iteration_bounds = array<i64: 1, 4>, scalar_prefetch = 0 : i64, scratch_operands = 0 : i64, tpu.core_type = #tpu.core_type<tc>, window_params = [{transform_indices = @transform_0, window_bounds = array<i64: 16, 128>}, {transform_indices = @transform_1, window_bounds = array<i64: 128, 128>}, {transform_indices = @transform_2, window_bounds = array<i64: 1, 128>}, {transform_indices = @transform_3, window_bounds = array<i64: 128, 128>}, {pipeline_mode = #tpu.pipeline_mode<synchronous>, transform_indices = @transform_4, window_bounds = array<i64: 1, 128>}, {transform_indices = @transform_5, window_bounds = array<i64: 16, 128>}]} {
    %c0_i32 = arith.constant 0 : i32
    %0 = arith.cmpi eq, %arg1, %c0_i32 : i32
    %1 = arith.extui %0 : i1 to i32
    %c0_i32_0 = arith.constant 0 : i32
    %2 = arith.cmpi ne, %1, %c0_i32_0 : i32
    scf.if %2 {
      %cst_17 = arith.constant 0.000000e+00 : f32
      %25 = vector.broadcast %cst_17 : f32 to vector<16x128xf32>
      %c0_18 = arith.constant 0 : index
      %c0_19 = arith.constant 0 : index
      %26 = vector.load %arg7[%c0_18, %c0_19] : memref<16x128xf32, #tpu.memory_space<vmem>>, vector<16x128xf32>
      tpu.vector_store %arg7[%c0_18, %c0_19], %25 {strides = array<i32>} : memref<16x128xf32, #tpu.memory_space<vmem>>, vector<16x128xf32>,
    } else {
    }
    %c0 = arith.constant 0 : index
    %c0_1 = arith.constant 0 : index
    %3 = vector.load %arg2[%c0, %c0_1] : memref<16x128xf32, #tpu.memory_space<vmem>>, vector<16x128xf32>
    %c0_2 = arith.constant 0 : index
    %c0_3 = arith.constant 0 : index
    %4 = vector.load %arg3[%c0_2, %c0_3] : memref<128x128xf32, #tpu.memory_space<vmem>>, vector<128x128xf32>
    %cst = arith.constant dense<0.000000e+00> : vector<16x128xf32>
    %5 = tpu.matmul %3, %4, %cst {dimension_numbers = #tpu.dot_dimension_numbers<[1], [0], [0], [1], [0, 0, 1, 1], [], []>} : vector<16x128xf32>, vector<128x128xf32>, vector<16x128xf32> -> vector<16x128xf32>
    %c0_4 = arith.constant 0 : index
    %c0_5 = arith.constant 0 : index
    %6 = vector.load %arg4[%c0_4, %c0_5] : memref<1x128xf32, #tpu.memory_space<vmem>>, vector<1x128xf32>
    %7 = vector.broadcast %6 : vector<1x128xf32> to vector<16x128xf32>
    %8 = arith.addf %5, %7 : vector<16x128xf32>
    %cst_6 = arith.constant 5.000000e-01 : f32
    %9 = vector.broadcast %cst_6 : f32 to vector<16x128xf32>
    %10 = arith.mulf %9, %8 : vector<16x128xf32>
    %cst_7 = arith.constant 0.707106769 : f32
    %11 = vector.broadcast %cst_7 : f32 to vector<16x128xf32>
    %12 = arith.mulf %8, %11 : vector<16x128xf32>
    %13 = math.erf %12 : vector<16x128xf32>
    %cst_8 = arith.constant 1.000000e+00 : f32
    %14 = vector.broadcast %cst_8 : f32 to vector<16x128xf32>
    %15 = arith.addf %14, %13 : vector<16x128xf32>
    %16 = arith.mulf %10, %15 : vector<16x128xf32>
    %c0_9 = arith.constant 0 : index
    %c0_10 = arith.constant 0 : index
    %17 = vector.load %arg7[%c0_9, %c0_10] : memref<16x128xf32, #tpu.memory_space<vmem>>, vector<16x128xf32>
    %c0_11 = arith.constant 0 : index
    %c0_12 = arith.constant 0 : index
    %18 = vector.load %arg5[%c0_11, %c0_12] : memref<128x128xf32, #tpu.memory_space<vmem>>, vector<128x128xf32>
    %cst_13 = arith.constant dense<0.000000e+00> : vector<16x128xf32>
    %19 = tpu.matmul %16, %18, %cst_13 {dimension_numbers = #tpu.dot_dimension_numbers<[1], [0], [0], [1], [0, 0, 1, 1], [], []>} : vector<16x128xf32>, vector<128x128xf32>, vector<16x128xf32> -> vector<16x128xf32>
    %20 = arith.addf %17, %19 : vector<16x128xf32>
    %c0_14 = arith.constant 0 : index
    %c0_15 = arith.constant 0 : index
    %21 = vector.load %arg7[%c0_14, %c0_15] : memref<16x128xf32, #tpu.memory_space<vmem>>, vector<16x128xf32>
    tpu.vector_store %arg7[%c0_14, %c0_15], %20 {strides = array<i32>} : memref<16x128xf32, #tpu.memory_space<vmem>>, vector<16x128xf32>,
    %c3_i32 = arith.constant 3 : i32
    %22 = arith.cmpi eq, %arg1, %c3_i32 : i32
    %23 = arith.extui %22 : i1 to i32
    %c0_i32_16 = arith.constant 0 : i32
    %24 = arith.cmpi ne, %23, %c0_i32_16 : i32
    scf.if %24 {
      %c0_17 = arith.constant 0 : index
      %c0_18 = arith.constant 0 : index
      %25 = vector.load %arg7[%c0_17, %c0_18] : memref<16x128xf32, #tpu.memory_space<vmem>>, vector<16x128xf32>
      %c0_19 = arith.constant 0 : index
      %c0_20 = arith.constant 0 : index
      %26 = vector.load %arg6[%c0_19, %c0_20] : memref<1x128xf32, #tpu.memory_space<vmem>>, vector<1x128xf32>
      %27 = vector.broadcast %26 : vector<1x128xf32> to vector<16x128xf32>
      %28 = arith.addf %25, %27 : vector<16x128xf32>
      %c0_21 = arith.constant 0 : index
      %c0_22 = arith.constant 0 : index
      %29 = vector.load %arg7[%c0_21, %c0_22] : memref<16x128xf32, #tpu.memory_space<vmem>>, vector<16x128xf32>
      tpu.vector_store %arg7[%c0_21, %c0_22], %28 {strides = array<i32>} : memref<16x128xf32, #tpu.memory_space<vmem>>, vector<16x128xf32>,
    } else {
    }
    return
  }
  func.func @transform_0(%arg0: i32, %arg1: i32) -> (i32, i32) {
    %c0_i32 = arith.constant 0 : i32
    %c0_i32_0 = arith.constant 0 : i32
    return %arg0, %c0_i32 : i32, i32
  }
  func.func @transform_1(%arg0: i32, %arg1: i32) -> (i32, i32) {
    %c0_i32 = arith.constant 0 : i32
    %c0_i32_0 = arith.constant 0 : i32
    return %c0_i32, %arg1 : i32, i32
  }
  func.func @transform_2(%arg0: i32, %arg1: i32) -> (i32, i32) {
    %c0_i32 = arith.constant 0 : i32
    %c0_i32_0 = arith.constant 0 : i32
    return %c0_i32, %arg1 : i32, i32
  }
  func.func @transform_3(%arg0: i32, %arg1: i32) -> (i32, i32) {
    %c0_i32 = arith.constant 0 : i32
    %c0_i32_0 = arith.constant 0 : i32
    return %arg1, %c0_i32 : i32, i32
  }
  func.func @transform_4(%arg0: i32, %arg1: i32) -> (i32, i32) {
    %c0_i32 = arith.constant 0 : i32
    %c0_i32_0 = arith.constant 0 : i32
    %c0_i32_1 = arith.constant 0 : i32
    return %c0_i32, %c0_i32_0 : i32, i32
  }
  func.func @transform_5(%arg0: i32, %arg1: i32) -> (i32, i32) {
    %c0_i32 = arith.constant 0 : i32
    %c0_i32_0 = arith.constant 0 : i32
    return %arg0, %c0_i32 : i32, i32
  }
}

</mosaic_0001>

<bundles_post_ra>
// kernel: tpu_custom_call.1
= control target key start
LH: loop header
LB: loop body
LE: loop exit
PB: predicated region body
PF: predicated region fallthrough
CT: control target
= control target key end

     0   :  { %s1311_s0 = inlined_call_operand.hbm [shape: f32[16,128], index: 0, kind: input, shape index: {}]   ;;  %s1312_s1 = inlined_call_operand.hbm [shape: f32[128,512], index: 1, kind: input, shape index: {}]   ;;  %s1313_s2 = inlined_call_operand.hbm [shape: f32[1,512], index: 2, kind: input, shape index: {}]   ;;  %s1314_s3 = inlined_call_operand.hbm [shape: f32[512,128], index: 3, kind: input, shape index: {}]   ;;  %s1315_s4 = inlined_call_operand.vmem [shape: f32[1,128], index: 4, kind: input, shape index: {}]   ;;  %s1316_s5 = inlined_call_operand.hbm [shape: f32[16,128], index: 5, kind: output, shape index: {}]  }
   0x1   :  { %1318 = sst [smem:[#allocation16_spill]] %s1311_s0 }
   0x2   :  { %1319 = sst [smem:[#allocation17_spill]] %s1312_s1 }
   0x3   :  { %1320 = sst [smem:[#allocation18_spill]] %s1313_s2 }
   0x4   :  { %10 = vsyncpa [#allocation3], 0 }
   0x5   :  { %11 = vsyncpa [#allocation6], 0 }
   0x6   :  { %13 = vsyncpa [#allocation6 + $0x1], 0 }
   0x7   :  { %14 = vsyncpa [#allocation9], 0 }
   0x8   :  { %16 = vsyncpa [#allocation9 + $0x1], 0 }
   0x9   :  { %17 = vsyncpa [#allocation4], 0  ;;  %s1076_s18 = smov 0   ;;  %s1078_s19 = smov 0  }
   0xa   :  { %s1080_s20 = smov 0   ;;  %s1082_s21 = smov 0  }
   0xb   :  { %s1084_s22 = smov 0   ;;  %s1086_s23 = smov 0  }
   0xc LB: > { %s32_s24 = sadd.s32 1, %s1032_s22  ;;  %s68_s25 = sadd.s32 1, %s1024_s20  ;;  %s1036_s23 = sphi %s1086_s23, %s23_s23   ;;  %s1032_s22 = sphi %s1084_s22, %s1334_s22   ;;  %s1028_s21 = sphi %s1082_s21, %s1333_s21   ;;  %s1024_s20 = sphi %s1080_s20, %s1332_s20   ;;  %s1020_s19 = sphi %s1078_s19, %s1331_s19   ;;  %s1016_s18 = sphi %s1076_s18, %s1330_s18  }
   0xd   : > { %p33_p0 = scmp.ge.s32.totalorder %s32_s24, 4  ;;  %p75_p1 = scmp.ne.s32.totalorder %s1024_s20, %s1020_s19 }
   0xe   : > { %p76_p2 = scmp.eq.s32.totalorder %s1036_s23, 0  ;;  %p760_p5 = scmp.lt.s32.totalorder %s1036_s23, 4 }
   0xf   : > { %s1336_s24 = smov (%p33_p0, %s32_s24), 0  ;;  %s224_s28 = sand.u32 1, %s1036_s23  }
  0x10   : > { %1321 = sst [smem:[#allocation15_spill]] %s1336_s24  ;;  %p1113_p3 = por %p76_p2, %p75_p1 }
  0x11   : > { %s65_s27 = ssub.s32 %s1032_s22, %s1336_s24  ;;  %s1122_s29 = sand.u32 1, %s1024_s20  }
  0x12   : > { %p66_p4 = scmp.eq.s32.totalorder %s65_s27, 0  ;;  %s681_s6 = sshll.u32 %s1122_s29, 7 }
  0x13   : > { %s682_s7 = sshll.u32 %s1032_s22, 3  ;;  %s1323_s1 = sld [smem:[#allocation17_spill]] }
  0x14   : > { %s1125_s30 = scalar_select %p66_p4, %s1024_s20, %s68_s25  }
  0x15   : > { %s228_s11 = scalar_lea.vmem [#allocation5], %s681_s6  ;;  %p1136_p6 = pnand %p760_p5, %p1113_p3 }
  0x16   : > { %s235_s12 = sshll.u32 %s228_s11, 4  ;;  %s1140_s15 = scalar_lea.sflag [#allocation6], %s224_s28  ;;  %s236_s12 = int_to_ptr.vmem [resolvable:$true] %s235_s12 }
  0x17   : > { %s1038_s16 = smov 512   ;;  %s1039_s17 = smov 128  }
  0x18   : > { %s1040_s25 = smov 8   ;;  %s1148_s27 = sadd.s32 4294967295, %s1036_s23  }
  0x19   : > { %s232_s10 = scalar_lea.hbm %s1323_s1, %s682_s7  ;;  %p81_p7 = scmp.ne.s32.totalorder %s1020_s19, %s1016_s18 }
  0x1a   : > { %s233_s13 = sshll.u32 %s232_s10, 4  ;;  %p82_p8 = scmp.eq.s32.totalorder %s1148_s27, 0  ;;  %s234_s13 = int_to_ptr.hbm [resolvable:$true] %s233_s13 }
  0x1b   : > { %752 = dma.hbm_to_vmem [thread:$0]  (!%p1136_p6), %s234_s13, 2048, %s236_s12, %s1140_s15, %s1038_s16, %s1039_s17, %s1040_s25  }
  0x1c   : > { %p678_p9 = scmp.ge.s32.totalorder %s1036_s23, 1  ;;  %p191_p10 = scmp.lt.s32.totalorder %s1036_s23, 5 }
  0x1d   : > { %p1157_p11 = por %p82_p8, %p81_p7  ;;  %s1326_s0 = sld [smem:[#allocation16_spill]] }
  0x1e   : > { %p1164_p12 = pnand %p678_p9, %p191_p10  ;;  %s1041_s18 = smov [#allocation2]  }
  0x1f   : > { %s207_s10 = sshll.u32 %s1041_s18, 4  ;;  %s1328_s2 = sld [smem:[#allocation18_spill]]  ;;  %s208_s10 = int_to_ptr.vmem [resolvable:$true] %s207_s10 }
  0x20   : > { %p745_p13 = pneg %p1164_p12  ;;  %s248_s28 = scalar_lea.vmem [#allocation7], %s1122_s29 }
  0x21   : > { %s255_s7 = sshll.u32 %s248_s28, 4  ;;  %s698_s18 = sshll.u32 %s1032_s22, 7  ;;  %s256_s7 = int_to_ptr.vmem [resolvable:$true] %s255_s7 }
  0x22   : > { %p746_p0 = pnand %p745_p13, %p82_p8  ;;  %s263_s24 = scalar_lea.sflag [#allocation9], %s1122_s29 }
  0x23   : > { %s205_s8 = sshll.u32 %s1326_s0, 4  ;;  %s266_s0 = scalar_lea.vmem [#allocation8], %s681_s6  ;;  %s206_s8 = int_to_ptr.hbm [resolvable:$true] %s205_s8 }
  0x24   : > { %748 = dma.hbm_to_vmem [thread:$0]  (!%p746_p0), %s206_s8, 256, %s208_s10, [#allocation3], %s1039_s17, %s1039_s17, %s1040_s25  }
  0x25   : > { %s251_s13 = scalar_lea.hbm %s1328_s2, %s1032_s22  ;;  %s274_s11 = sshll.u32 %s266_s0, 4  ;;  %s275_s11 = int_to_ptr.vmem [resolvable:$true] %s274_s11 }
  0x26   : > { %s253_s16 = sshll.u32 %s251_s13, 4  ;;  %s271_s2 = scalar_lea.hbm %s1314_s3, %s698_s18  ;;  %s254_s16 = int_to_ptr.hbm [resolvable:$true] %s253_s16 }
  0x27   : > { %755 = dma.hbm_to_vmem [thread:$0]  (!%p1136_p6), %s254_s16, 16, %s256_s7, %s1140_s15  }
  0x28   : > { %s272_s13 = sshll.u32 %s271_s2, 4  ;;  %286 = sbr.rel (%p1164_p12) target bundleno = 431 (0x1af), region = 40  ;;  %s273_s13 = int_to_ptr.hbm [resolvable:$true] %s272_s13 }
  0x29   : > { %758 = dma.hbm_to_vmem [thread:$0]  (!%p1136_p6), %s273_s13, 2048, %s275_s11, %s263_s24, %s1039_s17, %s1039_s17, %s1040_s25  }
  0x2d   : > { %999 = dma.done.wait (%p82_p8), [#allocation3], 256  }
  0x2e   : > { %1001 = vsyncadd (%p82_p8), [#allocation3], 4294967040  ;;  %s293_s0 = sand.u32 1, %s1148_s27   ;;  %s1203_s1 = sand.u32 1, %s1020_s19  }
  0x2f   : > { %s688_s2 = sshll.u32 %s1203_s1, 7  ;;  %s294_s29 = scalar_lea.sflag [#allocation6], %s293_s0 }
  0x30   : > { %s1206_s6 = scalar_lea.vmem [#allocation5], %s688_s2 }
  0x31   : > { %1003 = dma.done.wait (%p1157_p11), %s294_s29, 2064  }
  0x32   : > { %1005 = vsyncadd (%p1157_p11), %s294_s29, 4294965232  ;;  %s306_s24 = scalar_lea.vmem [#allocation7], %s1203_s1  ;;  %s313_s14 = scalar_lea.sflag [#allocation9], %s1203_s1 }
  0x33   : > { %s1214_s15 = scalar_lea.vmem [#allocation8], %s688_s2 }
  0x34   : > { %1007 = dma.done.wait (%p1157_p11), %s313_s14, 2048  }
  0x35   : > { %1009 = vsyncadd (%p1157_p11), %s313_s14, 4294965248  ;;  %p690_p1 = scmp.ne.s32.totalorder %s1028_s21, 0 }
  0x37   : > { %354 = sbr.rel (%p690_p1) target bundleno = 63 (0x3f), region = 60 }
  0x3c   : > { %v1042_v0 = vmov 0.0  }
  0x3d   : > { %355 = vst [vmem:[#allocation10] sm:$0xff] %v1042_v0 }
  0x3e   : > { %356 = vst [vmem:[#allocation10 + $0x8] sm:$0xff] %v1042_v0 }
  0x3f PF: > { %v374_v1 = vld [vmem:[%s1206_s6 + $0x78] sm:$0xff]  ;;  %v373_v2 = vld [vmem:[%s1206_s6 + $0x70] sm:$0xff]  ;;  %v372_v3 = vld [vmem:[%s1206_s6 + $0x68] sm:$0xff]  ;;  %p693_p2 = scmp.ne.s32.totalorder %s1028_s21, 3 }
  0x40   : > { %379 = vmatpush.msra.mxu0 %v374_v1  ;;  %699 = vmatpush.msra.mxu2 %v374_v1  ;;  %v371_v4 = vld [vmem:[%s1206_s6 + $0x60] sm:$0xff]  ;;  %v370_v5 = vld [vmem:[%s1206_s6 + $0x58] sm:$0xff]  ;;  %v369_v6 = vld [vmem:[%s1206_s6 + $0x50] sm:$0xff] }
  0x41   : > { %v368_v7 = vld [vmem:[%s1206_s6 + $0x48] sm:$0xff]  ;;  %v367_v8 = vld [vmem:[%s1206_s6 + $0x40] sm:$0xff]  ;;  %v366_v9 = vld [vmem:[%s1206_s6 + $0x38] sm:$0xff] }
  0x42   : > { %380 = vmatpush.msra.mxu0 %v373_v2  ;;  %700 = vmatpush.msra.mxu2 %v373_v2  ;;  %v365_v10 = vld [vmem:[%s1206_s6 + $0x30] sm:$0xff]  ;;  %v364_v11 = vld [vmem:[%s1206_s6 + $0x28] sm:$0xff]  ;;  %v363_v12 = vld [vmem:[%s1206_s6 + $0x20] sm:$0xff] }
  0x43   : > { %v362_v13 = vld [vmem:[%s1206_s6 + $0x18] sm:$0xff]  ;;  %v361_v14 = vld [vmem:[%s1206_s6 + $0x10] sm:$0xff]  ;;  %v360_v15 = vld [vmem:[%s1206_s6 + $0x8] sm:$0xff] }
  0x44   : > { %381 = vmatpush.msra.mxu0 %v372_v3  ;;  %701 = vmatpush.msra.mxu2 %v372_v3  ;;  %v359_v16 = vld [vmem:[%s1206_s6] sm:$0xff]  ;;  %v357_v17 = vld [vmem:[#allocation2] sm:$0xff]  ;;  %v358_v18 = vld [vmem:[#allocation2 + $0x8] sm:$0xff] }
  0x45   : > { %v507_v19 = vld [vmem:[%s1214_s15 + $0x78] sm:$0xff]  ;;  %v506_v20 = vld [vmem:[%s1214_s15 + $0x70] sm:$0xff]  ;;  %v505_v21 = vld [vmem:[%s1214_s15 + $0x68] sm:$0xff] }
  0x46   : > { %382 = vmatpush.msra.mxu0 %v371_v4  ;;  %702 = vmatpush.msra.mxu2 %v371_v4  ;;  %v504_v22 = vld [vmem:[%s1214_s15 + $0x60] sm:$0xff]  ;;  %v820_v23 = vld [vmem:[%s306_s24] ss:$0 sm:$0xff]  ;;  %v503_v24 = vld [vmem:[%s1214_s15 + $0x58] sm:$0xff] }
  0x47   : > { %508 = vmatpush.msra.mxu1 %v507_v19  ;;  %715 = vmatpush.msra.mxu3 %v507_v19  ;;  %v502_v26 = vld [vmem:[%s1214_s15 + $0x50] sm:$0xff]  ;;  %v501_v28 = vld [vmem:[%s1214_s15 + $0x48] sm:$0xff]  ;;  %v500_v30 = vld [vmem:[%s1214_s15 + $0x40] sm:$0xff] }
  0x48   : > { %383 = vmatpush.msra.mxu0 %v370_v5  ;;  %703 = vmatpush.msra.mxu2 %v370_v5  ;;  %v499_v31 = vld [vmem:[%s1214_s15 + $0x38] sm:$0xff]  ;;  %v498_v34 = vld [vmem:[%s1214_s15 + $0x30] sm:$0xff]  ;;  %v497_v37 = vld [vmem:[%s1214_s15 + $0x28] sm:$0xff] }
  0x49   : > { %509 = vmatpush.msra.mxu1 %v506_v20  ;;  %716 = vmatpush.msra.mxu3 %v506_v20  ;;  %v496_v40 = vld [vmem:[%s1214_s15 + $0x20] sm:$0xff]  ;;  %v495_v44 = vld [vmem:[%s1214_s15 + $0x18] sm:$0xff]  ;;  %v494_v48 = vld [vmem:[%s1214_s15 + $0x10] sm:$0xff] }
  0x4a   : > { %384 = vmatpush.msra.mxu0 %v369_v6  ;;  %704 = vmatpush.msra.mxu2 %v369_v6  ;;  %v493_v53 = vld [vmem:[%s1214_s15 + $0x8] sm:$0xff]  ;;  %v492_v57 = vld [vmem:[%s1214_s15] sm:$0xff] }
  0x4b   : > { %510 = vmatpush.msra.mxu1 %v505_v21  ;;  %717 = vmatpush.msra.mxu3 %v505_v21 }
  0x4c   : > { %385 = vmatpush.msra.mxu0 %v368_v7  ;;  %705 = vmatpush.msra.mxu2 %v368_v7 }
  0x4d   : > { %511 = vmatpush.msra.mxu1 %v504_v22  ;;  %718 = vmatpush.msra.mxu3 %v504_v22 }
  0x4e   : > { %386 = vmatpush.msra.mxu0 %v367_v8  ;;  %706 = vmatpush.msra.mxu2 %v367_v8 }
  0x4f   : > { %512 = vmatpush.msra.mxu1 %v503_v24  ;;  %719 = vmatpush.msra.mxu3 %v503_v24 }
  0x50   : > { %387 = vmatpush.msra.mxu0 %v366_v9  ;;  %707 = vmatpush.msra.mxu2 %v366_v9 }
  0x51   : > { %513 = vmatpush.msra.mxu1 %v502_v26  ;;  %720 = vmatpush.msra.mxu3 %v502_v26 }
  0x52   : > { %388 = vmatpush.msra.mxu0 %v365_v10  ;;  %708 = vmatpush.msra.mxu2 %v365_v10 }
  0x53   : > { %514 = vmatpush.msra.mxu1 %v501_v28  ;;  %721 = vmatpush.msra.mxu3 %v501_v28 }
  0x54   : > { %389 = vmatpush.msra.mxu0 %v364_v11  ;;  %709 = vmatpush.msra.mxu2 %v364_v11 }
  0x55   : > { %515 = vmatpush.msra.mxu1 %v500_v30  ;;  %722 = vmatpush.msra.mxu3 %v500_v30 }
  0x56   : > { %390 = vmatpush.msra.mxu0 %v363_v12  ;;  %710 = vmatpush.msra.mxu2 %v363_v12 }
  0x57   : > { %516 = vmatpush.msra.mxu1 %v499_v31  ;;  %723 = vmatpush.msra.mxu3 %v499_v31 }
  0x58   : > { %391 = vmatpush.msra.mxu0 %v362_v13  ;;  %711 = vmatpush.msra.mxu2 %v362_v13 }
  0x59   : > { %517 = vmatpush.msra.mxu1 %v498_v34  ;;  %724 = vmatpush.msra.mxu3 %v498_v34 }
  0x5a   : > { %392 = vmatpush.msra.mxu0 %v361_v14  ;;  %712 = vmatpush.msra.mxu2 %v361_v14 }
  0x5b   : > { %518 = vmatpush.msra.mxu1 %v497_v37  ;;  %725 = vmatpush.msra.mxu3 %v497_v37 }
  0x5c   : > { %393 = vmatpush.msra.mxu0 %v360_v15  ;;  %713 = vmatpush.msra.mxu2 %v360_v15 }
  0x5d   : > { %519 = vmatpush.msra.mxu1 %v496_v40  ;;  %726 = vmatpush.msra.mxu3 %v496_v40 }
  0x5e   : > { %394 = vmatpush.msra.mxu0 %v359_v16  ;;  %714 = vmatpush.msra.mxu2 %v359_v16 }
  0x5f   : > { %395 = vmatmul.f32.vlgmr.msra.gmra.mxu0 %v357_v17  ;;  %398 = vmatmul.f32.vlgmr.msra.gmra.mxu2 %v358_v18 }
  0x60   : > { %520 = vmatpush.msra.mxu1 %v495_v44  ;;  %727 = vmatpush.msra.mxu3 %v495_v44 }
  0x62   : > { %521 = vmatpush.msra.mxu1 %v494_v48  ;;  %728 = vmatpush.msra.mxu3 %v494_v48 }
  0x64   : > { %522 = vmatpush.msra.mxu1 %v493_v53  ;;  %729 = vmatpush.msra.mxu3 %v493_v53 }
  0x66   : > { %523 = vmatpush.msra.mxu1 %v492_v57  ;;  %730 = vmatpush.msra.mxu3 %v492_v57  ;;  %v490_v57 = vld [vmem:[#allocation10] sm:$0xff] }
  0xdc   : > { %v396_v25 = vpop.f32.mrf.mxu0 }
  0xdd   : > { %v1245_v27 = vadd.f32 %v820_v23, %v396_v25 }
  0xdf   : > { %v1249_v29 = vmul.f32 0.70710677, %v1245_v27  ;;  %v402_v48 = vmul.f32 0.5, %v1245_v27 }
  0xe1   : > { %v406_v32 = vmul.f32 %v1249_v29, %v1249_v29 }
  0xe2   : > { %v399_v33 = vpop.f32.mrf.mxu2 }
  0xe3   : > { %v1256_v35 = vmin.f32 %v406_v32, 16.0  ;;  %v1258_v36 = vadd.f32 %v820_v23, %v399_v33 }
  0xe5   : > { %v408_v38 = vmul.f32 2.1237322e-06, %v1256_v35  ;;  %v1263_v39 = vmul.f32 0.70710677, %v1258_v36  ;;  %v419_v41 = vmul.f32 3.8918573e-05, %v1256_v35 }
  0xe7   : > { %v409_v42 = vadd.f32 0.00028619796, %v408_v38  ;;  %v446_v43 = vmul.f32 %v1263_v39, %v1263_v39  ;;  %v420_v45 = vadd.f32 0.001143296, %v419_v41 }
  0xe9   : > { %v410_v46 = vmul.f32 %v409_v42, %v1256_v35  ;;  %v447_v47 = vmin.f32 %v446_v43, 16.0  ;;  %v421_v49 = vmul.f32 %v420_v45, %v1256_v35 }
  0xeb   : > { %v448_v50 = vmul.f32 2.1237322e-06, %v447_v47  ;;  %v459_v51 = vmul.f32 3.8918573e-05, %v447_v47  ;;  %v411_v52 = vadd.f32 0.0036580483, %v410_v46 }
  0xec   : > { %v422_v54 = vadd.f32 0.014752088, %v421_v49 }
  0xed   : > { %v449_v55 = vadd.f32 0.00028619796, %v448_v50  ;;  %v460_v56 = vadd.f32 0.001143296, %v459_v51  ;;  %v412_v61 = vmul.f32 %v411_v52, %v1256_v35 }
  0xee   : > { %v423_v58 = vmul.f32 %v422_v54, %v1256_v35  ;;  %v403_v54 = vmul.f32 0.5, %v1258_v36 }
  0xef   : > { %v450_v59 = vmul.f32 %v449_v55, %v447_v47  ;;  %v461_v60 = vmul.f32 %v460_v56, %v447_v47  ;;  %v413_v3 = vadd.f32 0.05243302, %v412_v61 }
  0xf0   : > { %v424_v62 = vadd.f32 0.112945676, %v423_v58 }
  0xf1   : > { %v451_v63 = vadd.f32 0.0036580483, %v450_v59  ;;  %v462_v0 = vadd.f32 0.014752088, %v461_v60  ;;  %v414_v9 = vmul.f32 %v413_v3, %v1256_v35 }
  0xf2   : > { %v425_v1 = vmul.f32 %v424_v62, %v1256_v35 }
  0xf3   : > { %v463_v2 = vmul.f32 %v462_v0, %v447_v47  ;;  %v452_v5 = vmul.f32 %v451_v63, %v447_v47  ;;  %v415_v14 = vadd.f32 0.18741608, %v414_v9 }
  0xf4   : > { %v426_v4 = vadd.f32 0.4994258, %v425_v1 }
  0xf5   : > { %v464_v6 = vadd.f32 0.112945676, %v463_v2  ;;  %v453_v11 = vadd.f32 0.05243302, %v452_v5  ;;  %v416_v18 = vmul.f32 %v415_v14, %v1256_v35 }
  0xf6   : > { %v427_v7 = vmul.f32 %v426_v4, %v1256_v35 }
  0xf7   : > { %v465_v8 = vmul.f32 %v464_v6, %v447_v47  ;;  %v454_v15 = vmul.f32 %v453_v11, %v447_v47  ;;  %v417_v22 = vadd.f32 1.1283791, %v416_v18 }
  0xf8   : > { %v428_v10 = vadd.f32 1.0, %v427_v7 }
  0xf9   : > { %v466_v12 = vadd.f32 0.4994258, %v465_v8  ;;  %v455_v19 = vadd.f32 0.18741608, %v454_v15  ;;  %v418_v32 = vmul.f32 %v417_v22, %v1249_v29 }
  0xfa   : > { %821 = vrcp.f32 %v428_v10  ;;  %v440_v23 = vand.u32 2147483648, %v428_v10  ;;  %v438_v28 = vand.u32 2147483647, %v428_v10  ;;  %vm434_vm1 = vweird.f32 %v428_v10 }
  0xfb   : > { %v467_v13 = vmul.f32 %v466_v12, %v447_v47  ;;  %v456_v25 = vmul.f32 %v455_v19, %v447_v47 }
  0xfc   : > { %v441_v33 = vor.u32 1.1754944e-38, %v440_v23  ;;  %vm439_vm3 = vcmp.eq.f32.partialorder %v438_v28, 8.507059e+37 }
  0xfd   : > { %v468_v16 = vadd.f32 1.0, %v467_v13  ;;  %v457_v37 = vadd.f32 1.1283791, %v456_v25 }
  0xff   : > { %823 = vrcp.f32 %v468_v16  ;;  %v480_v38 = vand.u32 2147483648, %v468_v16  ;;  %v478_v42 = vand.u32 2147483647, %v468_v16  ;;  %vm474_vm5 = vweird.f32 %v468_v16 }
 0x100   : > { %v822_v17 = vpop.eup %821  ;;  %v458_v47 = vmul.f32 %v457_v37, %v1263_v39  ;;  %v491_v39 = vld [vmem:[#allocation10 + $0x8] sm:$0xff] }
 0x101   : > { %v430_v20 = vmul.f32 %v822_v17, %v428_v10  ;;  %vm435_vm0 = vweird.f32 %v822_v17  ;;  %v481_v46 = vor.u32 1.1754944e-38, %v480_v38  ;;  %vm479_vm7 = vcmp.eq.f32.partialorder %v478_v42, 8.507059e+37 }
 0x102   : > { %vm436_vm2 = vmor %vm434_vm1, %vm435_vm0 }
 0x103   : > { %v431_v21 = vsub.f32 1.0, %v430_v20 }
 0x105   : > { %v824_v24 = vpop.eup %823  ;;  %v432_v26 = vmul.f32 %v822_v17, %v431_v21 }
 0x106   : > { %v470_v30 = vmul.f32 %v824_v24, %v468_v16  ;;  %vm475_vm4 = vweird.f32 %v824_v24 }
 0x107   : > { %v433_v31 = vadd.f32 %v822_v17, %v432_v26  ;;  %vm476_vm6 = vmor %vm474_vm5, %vm475_vm4 }
 0x108   : > { %v471_v34 = vsub.f32 1.0, %v470_v30 }
 0x109   : > { %v437_v35 = vsel %vm436_vm2, %v822_v17, %v433_v31 }
 0x10a   : > { %v442_v40 = vsel %vm439_vm3, %v441_v33, %v437_v35  ;;  %v472_v41 = vmul.f32 %v824_v24, %v471_v34 }
 0x10b   : > { %v443_v43 = vmul.f32 %v442_v40, %v418_v32 }
 0x10c   : > { %v473_v44 = vadd.f32 %v824_v24, %v472_v41 }
 0x10d   : > { %v691_v45 = vclamps-f32 %v443_v43, 1.0 }
 0x10e   : > { %v477_v29 = vsel %vm476_vm6, %v824_v24, %v473_v44 }
 0x10f   : > { %v486_v49 = vadd.f32 1.0, %v691_v45  ;;  %v482_v50 = vsel %vm479_vm7, %v481_v46, %v477_v29 }
 0x110   : > { %v483_v51 = vmul.f32 %v482_v50, %v458_v47 }
 0x111   : > { %v488_v52 = vmul.f32 %v486_v49, %v402_v48 }
 0x112   : > { %v692_v53 = vclamps-f32 %v483_v51, 1.0 }
 0x113   : > { %524 = vmatmul.f32.vlgmr.msra.gmra.mxu1 %v488_v52 }
 0x114   : > { %v487_v55 = vadd.f32 1.0, %v692_v53 }
 0x116   : > { %v489_v56 = vmul.f32 %v487_v55, %v403_v54 }
 0x118   : > { %527 = vmatmul.f32.vlgmr.msra.gmra.mxu3 %v489_v56 }
 0x190   : > { %v525_v58 = vpop.f32.mrf.mxu1 }
 0x191   : > { %v531_v59 = vadd.f32 %v525_v58, %v490_v57 }
 0x193   : > { %533 = vst [vmem:[#allocation10] sm:$0xff] %v531_v59 }
 0x19a   : > { %538 = sbr.rel (%p693_p2) target bundleno = 425 (0x1a9), region = 64 }
 0x19b   : > { %v528_v60 = vpop.f32.mrf.mxu3 }
 0x19c   : > { %v532_v61 = vadd.f32 %v528_v60, %v491_v39 }
 0x19e   : > { %534 = vst [vmem:[#allocation10 + $0x8] sm:$0xff] %v532_v61 }
 0x19f   : > { %v539_v27 = vld [vmem:[#allocation10] sm:$0xff]  ;;  %v825_v62 = vld [vmem:[%s1315_s4] ss:$0 sm:$0xff] }
 0x1a0   : > { %v545_v63 = vadd.f32 %v825_v62, %v539_v27 }
 0x1a2   : > { %547 = vst [vmem:[#allocation10] sm:$0xff] %v545_v63 }
 0x1a5   : > { %v540_v36 = vld [vmem:[#allocation10 + $0x8] sm:$0xff] }
 0x1a6   : > { %v546_v0 = vadd.f32 %v825_v62, %v540_v36 }
 0x1a8   : > { %548 = vst [vmem:[#allocation10 + $0x8] sm:$0xff] %v546_v0 }
 0x1a9 PF: > { %p762_p3 = scmp.eq.s32.totalorder %s1148_s27, 3  ;;  %s559_s9 = sshll.u32 %s1316_s5, 4  ;;  %s560_s9 = int_to_ptr.hbm [resolvable:$true] %s559_s9 }
 0x1aa   : > { %s1043_s10 = smov [#allocation10]   ;;  %s1044_s16 = smov 128  }
 0x1ab   : > { %s557_s21 = sshll.u32 %s1043_s10, 4  ;;  %s1045_s28 = smov 8   ;;  %s558_s21 = int_to_ptr.vmem [resolvable:$true] %s557_s21 }
 0x1ac   : > { %742 = dma.vmem_to_hbm [thread:$0]  (%p762_p3), %s558_s21, 256, %s560_s9, [#allocation4], %s1044_s16, %s1044_s16, %s1045_s28  }
 0x1ad   : > { %1011 = dma.done.wait (%p762_p3), [#allocation4], 256  }
 0x1ae   : > { %1013 = vsyncadd (%p762_p3), [#allocation4], 4294967040 }
 0x1af PF: > { %s23_s23 = sadd.s32 1, %s1036_s23   ;;  %s1329_s27 = sld [smem:[#allocation15_spill]] }
 0x1b0   : > { %p20_p4 = scmp.ge.s32.totalorder %s23_s23, 6   ;;  %s1330_s18 = smov %s1020_s19 }
 0x1b1   : > { %s1331_s19 = smov %s1024_s20  ;;  %s1332_s20 = smov %s1125_s30 }
 0x1b2   : > { %s1333_s21 = smov %s1032_s22  ;;  %22 = sbr.rel (!%p20_p4) target bundleno = 12 (0xc), region = 116 }
 0x1b5   : > { %s1334_s22 = smov %s1329_s27 }
 0x1b7   :  { %576 = vsyncpa [#allocation3], 1 }
 0x1b8   :  { %578 = vsyncpa [#allocation3 + $0x1], 1 }
 0x1b9   :  { %579 = vsyncpa [#allocation6], 1 }
 0x1ba   :  { %581 = vsyncpa [#allocation6 + $0x1], 1 }
 0x1bb   :  { %582 = vsyncpa [#allocation9], 1 }
 0x1bc   :  { %584 = vsyncpa [#allocation9 + $0x1], 1 }
 0x1bd   :  { %585 = vsyncpa [#allocation4], 1 }
 0x1be   :  { %587 = vsyncpa [#allocation4 + $0x1], 1 }

// kernel: tpu_custom_call.1
= control target key start
LH: loop header
LB: loop body
LE: loop exit
PB: predicated region body
PF: predicated region fallthrough
CT: control target
= control target key end

     0   :  { %s1311_s0 = inlined_call_operand.hbm [shape: f32[16,128], index: 0, kind: input, shape index: {}]   ;;  %s1312_s1 = inlined_call_operand.hbm [shape: f32[128,512], index: 1, kind: input, shape index: {}]   ;;  %s1313_s2 = inlined_call_operand.hbm [shape: f32[1,512], index: 2, kind: input, shape index: {}]   ;;  %s1314_s3 = inlined_call_operand.hbm [shape: f32[512,128], index: 3, kind: input, shape index: {}]   ;;  %s1315_s4 = inlined_call_operand.vmem [shape: f32[1,128], index: 4, kind: input, shape index: {}]   ;;  %s1316_s5 = inlined_call_operand.hbm [shape: f32[16,128], index: 5, kind: output, shape index: {}]  }
   0x1   :  { %1318 = sst [smem:[#allocation16_spill]] %s1311_s0 }
   0x2   :  { %1319 = sst [smem:[#allocation17_spill]] %s1312_s1 }
   0x3   :  { %1320 = sst [smem:[#allocation18_spill]] %s1313_s2 }
   0x4   :  { %10 = vsyncpa [#allocation3], 0 }
   0x5   :  { %11 = vsyncpa [#allocation6], 0 }
   0x6   :  { %13 = vsyncpa [#allocation6 + $0x1], 0 }
   0x7   :  { %14 = vsyncpa [#allocation9], 0 }
   0x8   :  { %16 = vsyncpa [#allocation9 + $0x1], 0 }
   0x9   :  { %17 = vsyncpa [#allocation4], 0  ;;  %s1076_s18 = smov 0   ;;  %s1078_s19 = smov 0  }
   0xa   :  { %s1080_s20 = smov 0   ;;  %s1082_s21 = smov 0  }
   0xb   :  { %s1084_s22 = smov 0   ;;  %s1086_s23 = smov 0  }
   0xc LB: > { %s32_s24 = sadd.s32 1, %s1032_s22  ;;  %s68_s25 = sadd.s32 1, %s1024_s20  ;;  %s1036_s23 = sphi %s1086_s23, %s23_s23   ;;  %s1032_s22 = sphi %s1084_s22, %s1334_s22   ;;  %s1028_s21 = sphi %s1082_s21, %s1333_s21   ;;  %s1024_s20 = sphi %s1080_s20, %s1332_s20   ;;  %s1020_s19 = sphi %s1078_s19, %s1331_s19   ;;  %s1016_s18 = sphi %s1076_s18, %s1330_s18  }
   0xd   : > { %p33_p0 = scmp.ge.s32.totalorder %s32_s24, 4  ;;  %p75_p1 = scmp.ne.s32.totalorder %s1024_s20, %s1020_s19 }
   0xe   : > { %p76_p2 = scmp.eq.s32.totalorder %s1036_s23, 0  ;;  %p760_p5 = scmp.lt.s32.totalorder %s1036_s23, 4 }
   0xf   : > { %s1336_s24 = smov (%p33_p0, %s32_s24), 0  ;;  %s224_s28 = sand.u32 1, %s1036_s23  }
  0x10   : > { %1321 = sst [smem:[#allocation15_spill]] %s1336_s24  ;;  %p1113_p3 = por %p76_p2, %p75_p1 }
  0x11   : > { %s65_s27 = ssub.s32 %s1032_s22, %s1336_s24  ;;  %s1122_s29 = sand.u32 1, %s1024_s20  }
  0x12   : > { %p66_p4 = scmp.eq.s32.totalorder %s65_s27, 0  ;;  %s681_s6 = sshll.u32 %s1122_s29, 7 }
  0x13   : > { %s682_s7 = sshll.u32 %s1032_s22, 3  ;;  %s1323_s1 = sld [smem:[#allocation17_spill]] }
  0x14   : > { %s1125_s30 = scalar_select %p66_p4, %s1024_s20, %s68_s25  }
  0x15   : > { %s228_s11 = scalar_lea.vmem [#allocation5], %s681_s6  ;;  %p1136_p6 = pnand %p760_p5, %p1113_p3 }
  0x16   : > { %s235_s12 = sshll.u32 %s228_s11, 4  ;;  %s1140_s15 = scalar_lea.sflag [#allocation6], %s224_s28  ;;  %s236_s12 = int_to_ptr.vmem [resolvable:$true] %s235_s12 }
  0x17   : > { %s1038_s16 = smov 512   ;;  %s1039_s17 = smov 128  }
  0x18   : > { %s1040_s25 = smov 8   ;;  %s1148_s27 = sadd.s32 4294967295, %s1036_s23  }
  0x19   : > { %s232_s10 = scalar_lea.hbm %s1323_s1, %s682_s7  ;;  %p81_p7 = scmp.ne.s32.totalorder %s1020_s19, %s1016_s18 }
  0x1a   : > { %s233_s13 = sshll.u32 %s232_s10, 4  ;;  %p82_p8 = scmp.eq.s32.totalorder %s1148_s27, 0  ;;  %s234_s13 = int_to_ptr.hbm [resolvable:$true] %s233_s13 }
  0x1b   : > { %752 = dma.hbm_to_vmem [thread:$0]  (!%p1136_p6), %s234_s13, 2048, %s236_s12, %s1140_s15, %s1038_s16, %s1039_s17, %s1040_s25  }
  0x1c   : > { %p678_p9 = scmp.ge.s32.totalorder %s1036_s23, 1  ;;  %p191_p10 = scmp.lt.s32.totalorder %s1036_s23, 5 }
  0x1d   : > { %p1157_p11 = por %p82_p8, %p81_p7  ;;  %s1326_s0 = sld [smem:[#allocation16_spill]] }
  0x1e   : > { %p1164_p12 = pnand %p678_p9, %p191_p10  ;;  %s1041_s18 = smov [#allocation2]  }
  0x1f   : > { %s207_s10 = sshll.u32 %s1041_s18, 4  ;;  %s1328_s2 = sld [smem:[#allocation18_spill]]  ;;  %s208_s10 = int_to_ptr.vmem [resolvable:$true] %s207_s10 }
  0x20   : > { %p745_p13 = pneg %p1164_p12  ;;  %s248_s28 = scalar_lea.vmem [#allocation7], %s1122_s29 }
  0x21   : > { %s255_s7 = sshll.u32 %s248_s28, 4  ;;  %s698_s18 = sshll.u32 %s1032_s22, 7  ;;  %s256_s7 = int_to_ptr.vmem [resolvable:$true] %s255_s7 }
  0x22   : > { %p746_p0 = pnand %p745_p13, %p82_p8  ;;  %s263_s24 = scalar_lea.sflag [#allocation9], %s1122_s29 }
  0x23   : > { %s205_s8 = sshll.u32 %s1326_s0, 4  ;;  %s266_s0 = scalar_lea.vmem [#allocation8], %s681_s6  ;;  %s206_s8 = int_to_ptr.hbm [resolvable:$true] %s205_s8 }
  0x24   : > { %748 = dma.hbm_to_vmem [thread:$0]  (!%p746_p0), %s206_s8, 256, %s208_s10, [#allocation3], %s1039_s17, %s1039_s17, %s1040_s25  }
  0x25   : > { %s251_s13 = scalar_lea.hbm %s1328_s2, %s1032_s22  ;;  %s274_s11 = sshll.u32 %s266_s0, 4  ;;  %s275_s11 = int_to_ptr.vmem [resolvable:$true] %s274_s11 }
  0x26   : > { %s253_s16 = sshll.u32 %s251_s13, 4  ;;  %s271_s2 = scalar_lea.hbm %s1314_s3, %s698_s18  ;;  %s254_s16 = int_to_ptr.hbm [resolvable:$true] %s253_s16 }
  0x27   : > { %755 = dma.hbm_to_vmem [thread:$0]  (!%p1136_p6), %s254_s16, 16, %s256_s7, %s1140_s15  }
  0x28   : > { %s272_s13 = sshll.u32 %s271_s2, 4  ;;  %286 = sbr.rel (%p1164_p12) target bundleno = 431 (0x1af), region = 40  ;;  %s273_s13 = int_to_ptr.hbm [resolvable:$true] %s272_s13 }
  0x29   : > { %758 = dma.hbm_to_vmem [thread:$0]  (!%p1136_p6), %s273_s13, 2048, %s275_s11, %s263_s24, %s1039_s17, %s1039_s17, %s1040_s25  }
  0x2d   : > { %999 = dma.done.wait (%p82_p8), [#allocation3], 256  }
  0x2e   : > { %1001 = vsyncadd (%p82_p8), [#allocation3], 4294967040  ;;  %s293_s0 = sand.u32 1, %s1148_s27   ;;  %s1203_s1 = sand.u32 1, %s1020_s19  }
  0x2f   : > { %s688_s2 = sshll.u32 %s1203_s1, 7  ;;  %s294_s29 = scalar_lea.sflag [#allocation6], %s293_s0 }
  0x30   : > { %s1206_s6 = scalar_lea.vmem [#allocation5], %s688_s2 }
  0x31   : > { %1003 = dma.done.wait (%p1157_p11), %s294_s29, 2064  }
  0x32   : > { %1005 = vsyncadd (%p1157_p11), %s294_s29, 4294965232  ;;  %s306_s24 = scalar_lea.vmem [#allocation7], %s1203_s1  ;;  %s313_s14 = scalar_lea.sflag [#allocation9], %s1203_s1 }
  0x33   : > { %s1214_s15 = scalar_lea.vmem [#allocation8], %s688_s2 }
  0x34   : > { %1007 = dma.done.wait (%p1157_p11), %s313_s14, 2048  }
  0x35   : > { %1009 = vsyncadd (%p1157_p11), %s313_s14, 4294965248  ;;  %p690_p1 = scmp.ne.s32.totalorder %s1028_s21, 0 }
  0x37   : > { %354 = sbr.rel (%p690_p1) target bundleno = 63 (0x3f), region = 60 }
  0x3c   : > { %v1042_v0 = vmov 0.0  }
  0x3d   : > { %355 = vst [vmem:[#allocation10] sm:$0xff] %v1042_v0 }
  0x3e   : > { %356 = vst [vmem:[#allocation10 + $0x8] sm:$0xff] %v1042_v0 }
  0x3f PF: > { %v374_v1 = vld [vmem:[%s1206_s6 + $0x78] sm:$0xff]  ;;  %v373_v2 = vld [vmem:[%s1206_s6 + $0x70] sm:$0xff]  ;;  %v372_v3 = vld [vmem:[%s1206_s6 + $0x68] sm:$0xff]  ;;  %p693_p2 = scmp.ne.s32.totalorder %s1028_s21, 3 }
  0x40   : > { %379 = vmatpush.msra.mxu0 %v374_v1  ;;  %699 = vmatpush.msra.mxu2 %v374_v1  ;;  %v371_v4 = vld [vmem:[%s1206_s6 + $0x60] sm:$0xff]  ;;  %v370_v5 = vld [vmem:[%s1206_s6 + $0x58] sm:$0xff]  ;;  %v369_v6 = vld [vmem:[%s1206_s6 + $0x50] sm:$0xff] }
  0x41   : > { %v368_v7 = vld [vmem:[%s1206_s6 + $0x48] sm:$0xff]  ;;  %v367_v8 = vld [vmem:[%s1206_s6 + $0x40] sm:$0xff]  ;;  %v366_v9 = vld [vmem:[%s1206_s6 + $0x38] sm:$0xff] }
  0x42   : > { %380 = vmatpush.msra.mxu0 %v373_v2  ;;  %700 = vmatpush.msra.mxu2 %v373_v2  ;;  %v365_v10 = vld [vmem:[%s1206_s6 + $0x30] sm:$0xff]  ;;  %v364_v11 = vld [vmem:[%s1206_s6 + $0x28] sm:$0xff]  ;;  %v363_v12 = vld [vmem:[%s1206_s6 + $0x20] sm:$0xff] }
  0x43   : > { %v362_v13 = vld [vmem:[%s1206_s6 + $0x18] sm:$0xff]  ;;  %v361_v14 = vld [vmem:[%s1206_s6 + $0x10] sm:$0xff]  ;;  %v360_v15 = vld [vmem:[%s1206_s6 + $0x8] sm:$0xff] }
  0x44   : > { %381 = vmatpush.msra.mxu0 %v372_v3  ;;  %701 = vmatpush.msra.mxu2 %v372_v3  ;;  %v359_v16 = vld [vmem:[%s1206_s6] sm:$0xff]  ;;  %v357_v17 = vld [vmem:[#allocation2] sm:$0xff]  ;;  %v358_v18 = vld [vmem:[#allocation2 + $0x8] sm:$0xff] }
  0x45   : > { %v507_v19 = vld [vmem:[%s1214_s15 + $0x78] sm:$0xff]  ;;  %v506_v20 = vld [vmem:[%s1214_s15 + $0x70] sm:$0xff]  ;;  %v505_v21 = vld [vmem:[%s1214_s15 + $0x68] sm:$0xff] }
  0x46   : > { %382 = vmatpush.msra.mxu0 %v371_v4  ;;  %702 = vmatpush.msra.mxu2 %v371_v4  ;;  %v504_v22 = vld [vmem:[%s1214_s15 + $0x60] sm:$0xff]  ;;  %v820_v23 = vld [vmem:[%s306_s24] ss:$0 sm:$0xff]  ;;  %v503_v24 = vld [vmem:[%s1214_s15 + $0x58] sm:$0xff] }
  0x47   : > { %508 = vmatpush.msra.mxu1 %v507_v19  ;;  %715 = vmatpush.msra.mxu3 %v507_v19  ;;  %v502_v26 = vld [vmem:[%s1214_s15 + $0x50] sm:$0xff]  ;;  %v501_v28 = vld [vmem:[%s1214_s15 + $0x48] sm:$0xff]  ;;  %v500_v30 = vld [vmem:[%s1214_s15 + $0x40] sm:$0xff] }
  0x48   : > { %383 = vmatpush.msra.mxu0 %v370_v5  ;;  %703 = vmatpush.msra.mxu2 %v370_v5  ;;  %v499_v31 = vld [vmem:[%s1214_s15 + $0x38] sm:$0xff]  ;;  %v498_v34 = vld [vmem:[%s1214_s15 + $0x30] sm:$0xff]  ;;  %v497_v37 = vld [vmem:[%s1214_s15 + $0x28] sm:$0xff] }
  0x49   : > { %509 = vmatpush.msra.mxu1 %v506_v20  ;;  %716 = vmatpush.msra.mxu3 %v506_v20  ;;  %v496_v40 = vld [vmem:[%s1214_s15 + $0x20] sm:$0xff]  ;;  %v495_v44 = vld [vmem:[%s1214_s15 + $0x18] sm:$0xff]  ;;  %v494_v48 = vld [vmem:[%s1214_s15 + $0x10] sm:$0xff] }
  0x4a   : > { %384 = vmatpush.msra.mxu0 %v369_v6  ;;  %704 = vmatpush.msra.mxu2 %v369_v6  ;;  %v493_v53 = vld [vmem:[%s1214_s15 + $0x8] sm:$0xff]  ;;  %v492_v57 = vld [vmem:[%s1214_s15] sm:$0xff] }
  0x4b   : > { %510 = vmatpush.msra.mxu1 %v505_v21  ;;  %717 = vmatpush.msra.mxu3 %v505_v21 }
  0x4c   : > { %385 = vmatpush.msra.mxu0 %v368_v7  ;;  %705 = vmatpush.msra.mxu2 %v368_v7 }
  0x4d   : > { %511 = vmatpush.msra.mxu1 %v504_v22  ;;  %718 = vmatpush.msra.mxu3 %v504_v22 }
  0x4e   : > { %386 = vmatpush.msra.mxu0 %v367_v8  ;;  %706 = vmatpush.msra.mxu2 %v367_v8 }
  0x4f   : > { %512 = vmatpush.msra.mxu1 %v503_v24  ;;  %719 = vmatpush.msra.mxu3 %v503_v24 }
  0x50   : > { %387 = vmatpush.msra.mxu0 %v366_v9  ;;  %707 = vmatpush.msra.mxu2 %v366_v9 }
  0x51   : > { %513 = vmatpush.msra.mxu1 %v502_v26  ;;  %720 = vmatpush.msra.mxu3 %v502_v26 }
  0x52   : > { %388 = vmatpush.msra.mxu0 %v365_v10  ;;  %708 = vmatpush.msra.mxu2 %v365_v10 }
  0x53   : > { %514 = vmatpush.msra.mxu1 %v501_v28  ;;  %721 = vmatpush.msra.mxu3 %v501_v28 }
  0x54   : > { %389 = vmatpush.msra.mxu0 %v364_v11  ;;  %709 = vmatpush.msra.mxu2 %v364_v11 }
  0x55   : > { %515 = vmatpush.msra.mxu1 %v500_v30  ;;  %722 = vmatpush.msra.mxu3 %v500_v30 }
  0x56   : > { %390 = vmatpush.msra.mxu0 %v363_v12  ;;  %710 = vmatpush.msra.mxu2 %v363_v12 }
  0x57   : > { %516 = vmatpush.msra.mxu1 %v499_v31  ;;  %723 = vmatpush.msra.mxu3 %v499_v31 }
  0x58   : > { %391 = vmatpush.msra.mxu0 %v362_v13  ;;  %711 = vmatpush.msra.mxu2 %v362_v13 }
  0x59   : > { %517 = vmatpush.msra.mxu1 %v498_v34  ;;  %724 = vmatpush.msra.mxu3 %v498_v34 }
  0x5a   : > { %392 = vmatpush.msra.mxu0 %v361_v14  ;;  %712 = vmatpush.msra.mxu2 %v361_v14 }
  0x5b   : > { %518 = vmatpush.msra.mxu1 %v497_v37  ;;  %725 = vmatpush.msra.mxu3 %v497_v37 }
  0x5c   : > { %393 = vmatpush.msra.mxu0 %v360_v15  ;;  %713 = vmatpush.msra.mxu2 %v360_v15 }
  0x5d   : > { %519 = vmatpush.msra.mxu1 %v496_v40  ;;  %726 = vmatpush.msra.mxu3 %v496_v40 }
  0x5e   : > { %394 = vmatpush.msra.mxu0 %v359_v16  ;;  %714 = vmatpush.msra.mxu2 %v359_v16 }
  0x5f   : > { %395 = vmatmul.f32.vlgmr.msra.gmra.mxu0 %v357_v17  ;;  %398 = vmatmul.f32.vlgmr.msra.gmra.mxu2 %v358_v18 }
  0x60   : > { %520 = vmatpush.msra.mxu1 %v495_v44  ;;  %727 = vmatpush.msra.mxu3 %v495_v44 }
  0x62   : > { %521 = vmatpush.msra.mxu1 %v494_v48  ;;  %728 = vmatpush.msra.mxu3 %v494_v48 }
  0x64   : > { %522 = vmatpush.msra.mxu1 %v493_v53  ;;  %729 = vmatpush.msra.mxu3 %v493_v53 }
  0x66   : > { %523 = vmatpush.msra.mxu1 %v492_v57  ;;  %730 = vmatpush.msra.mxu3 %v492_v57  ;;  %v490_v57 = vld [vmem:[#allocation10] sm:$0xff] }
  0xdc   : > { %v396_v25 = vpop.f32.mrf.mxu0 }
  0xdd   : > { %v1245_v27 = vadd.f32 %v820_v23, %v396_v25 }
  0xdf   : > { %v1249_v29 = vmul.f32 0.70710677, %v1245_v27  ;;  %v402_v48 = vmul.f32 0.5, %v1245_v27 }
  0xe1   : > { %v406_v32 = vmul.f32 %v1249_v29, %v1249_v29 }
  0xe2   : > { %v399_v33 = vpop.f32.mrf.mxu2 }
  0xe3   : > { %v1256_v35 = vmin.f32 %v406_v32, 16.0  ;;  %v1258_v36 = vadd.f32 %v820_v23, %v399_v33 }
  0xe5   : > { %v408_v38 = vmul.f32 2.1237322e-06, %v1256_v35  ;;  %v1263_v39 = vmul.f32 0.70710677, %v1258_v36  ;;  %v419_v41 = vmul.f32 3.8918573e-05, %v1256_v35 }
  0xe7   : > { %v409_v42 = vadd.f32 0.00028619796, %v408_v38  ;;  %v446_v43 = vmul.f32 %v1263_v39, %v1263_v39  ;;  %v420_v45 = vadd.f32 0.001143296, %v419_v41 }
  0xe9   : > { %v410_v46 = vmul.f32 %v409_v42, %v1256_v35  ;;  %v447_v47 = vmin.f32 %v446_v43, 16.0  ;;  %v421_v49 = vmul.f32 %v420_v45, %v1256_v35 }
  0xeb   : > { %v448_v50 = vmul.f32 2.1237322e-06, %v447_v47  ;;  %v459_v51 = vmul.f32 3.8918573e-05, %v447_v47  ;;  %v411_v52 = vadd.f32 0.0036580483, %v410_v46 }
  0xec   : > { %v422_v54 = vadd.f32 0.014752088, %v421_v49 }
  0xed   : > { %v449_v55 = vadd.f32 0.00028619796, %v448_v50  ;;  %v460_v56 = vadd.f32 0.001143296, %v459_v51  ;;  %v412_v61 = vmul.f32 %v411_v52, %v1256_v35 }
  0xee   : > { %v423_v58 = vmul.f32 %v422_v54, %v1256_v35  ;;  %v403_v54 = vmul.f32 0.5, %v1258_v36 }
  0xef   : > { %v450_v59 = vmul.f32 %v449_v55, %v447_v47  ;;  %v461_v60 = vmul.f32 %v460_v56, %v447_v47  ;;  %v413_v3 = vadd.f32 0.05243302, %v412_v61 }
  0xf0   : > { %v424_v62 = vadd.f32 0.112945676, %v423_v58 }
  0xf1   : > { %v451_v63 = vadd.f32 0.0036580483, %v450_v59  ;;  %v462_v0 = vadd.f32 0.014752088, %v461_v60  ;;  %v414_v9 = vmul.f32 %v413_v3, %v1256_v35 }
  0xf2   : > { %v425_v1 = vmul.f32 %v424_v62, %v1256_v35 }
  0xf3   : > { %v463_v2 = vmul.f32 %v462_v0, %v447_v47  ;;  %v452_v5 = vmul.f32 %v451_v63, %v447_v47  ;;  %v415_v14 = vadd.f32 0.18741608, %v414_v9 }
  0xf4   : > { %v426_v4 = vadd.f32 0.4994258, %v425_v1 }
  0xf5   : > { %v464_v6 = vadd.f32 0.112945676, %v463_v2  ;;  %v453_v11 = vadd.f32 0.05243302, %v452_v5  ;;  %v416_v18 = vmul.f32 %v415_v14, %v1256_v35 }
  0xf6   : > { %v427_v7 = vmul.f32 %v426_v4, %v1256_v35 }
  0xf7   : > { %v465_v8 = vmul.f32 %v464_v6, %v447_v47  ;;  %v454_v15 = vmul.f32 %v453_v11, %v447_v47  ;;  %v417_v22 = vadd.f32 1.1283791, %v416_v18 }
  0xf8   : > { %v428_v10 = vadd.f32 1.0, %v427_v7 }
  0xf9   : > { %v466_v12 = vadd.f32 0.4994258, %v465_v8  ;;  %v455_v19 = vadd.f32 0.18741608, %v454_v15  ;;  %v418_v32 = vmul.f32 %v417_v22, %v1249_v29 }
  0xfa   : > { %821 = vrcp.f32 %v428_v10  ;;  %v440_v23 = vand.u32 2147483648, %v428_v10  ;;  %v438_v28 = vand.u32 2147483647, %v428_v10  ;;  %vm434_vm1 = vweird.f32 %v428_v10 }
  0xfb   : > { %v467_v13 = vmul.f32 %v466_v12, %v447_v47  ;;  %v456_v25 = vmul.f32 %v455_v19, %v447_v47 }
  0xfc   : > { %v441_v33 = vor.u32 1.1754944e-38, %v440_v23  ;;  %vm439_vm3 = vcmp.eq.f32.partialorder %v438_v28, 8.507059e+37 }
  0xfd   : > { %v468_v16 = vadd.f32 1.0, %v467_v13  ;;  %v457_v37 = vadd.f32 1.1283791, %v456_v25 }
  0xff   : > { %823 = vrcp.f32 %v468_v16  ;;  %v480_v38 = vand.u32 2147483648, %v468_v16  ;;  %v478_v42 = vand.u32 2147483647, %v468_v16  ;;  %vm474_vm5 = vweird.f32 %v468_v16 }
 0x100   : > { %v822_v17 = vpop.eup %821  ;;  %v458_v47 = vmul.f32 %v457_v37, %v1263_v39  ;;  %v491_v39 = vld [vmem:[#allocation10 + $0x8] sm:$0xff] }
 0x101   : > { %v430_v20 = vmul.f32 %v822_v17, %v428_v10  ;;  %vm435_vm0 = vweird.f32 %v822_v17  ;;  %v481_v46 = vor.u32 1.1754944e-38, %v480_v38  ;;  %vm479_vm7 = vcmp.eq.f32.partialorder %v478_v42, 8.507059e+37 }
 0x102   : > { %vm436_vm2 = vmor %vm434_vm1, %vm435_vm0 }
 0x103   : > { %v431_v21 = vsub.f32 1.0, %v430_v20 }
 0x105   : > { %v824_v24 = vpop.eup %823  ;;  %v432_v26 = vmul.f32 %v822_v17, %v431_v21 }
 0x106   : > { %v470_v30 = vmul.f32 %v824_v24, %v468_v16  ;;  %vm475_vm4 = vweird.f32 %v824_v24 }
 0x107   : > { %v433_v31 = vadd.f32 %v822_v17, %v432_v26  ;;  %vm476_vm6 = vmor %vm474_vm5, %vm475_vm4 }
 0x108   : > { %v471_v34 = vsub.f32 1.0, %v470_v30 }
 0x109   : > { %v437_v35 = vsel %vm436_vm2, %v822_v17, %v433_v31 }
 0x10a   : > { %v442_v40 = vsel %vm439_vm3, %v441_v33, %v437_v35  ;;  %v472_v41 = vmul.f32 %v824_v24, %v471_v34 }
 0x10b   : > { %v443_v43 = vmul.f32 %v442_v40, %v418_v32 }
 0x10c   : > { %v473_v44 = vadd.f32 %v824_v24, %v472_v41 }
 0x10d   : > { %v691_v45 = vclamps-f32 %v443_v43, 1.0 }
 0x10e   : > { %v477_v29 = vsel %vm476_vm6, %v824_v24, %v473_v44 }
 0x10f   : > { %v486_v49 = vadd.f32 1.0, %v691_v45  ;;  %v482_v50 = vsel %vm479_vm7, %v481_v46, %v477_v29 }
 0x110   : > { %v483_v51 = vmul.f32 %v482_v50, %v458_v47 }
 0x111   : > { %v488_v52 = vmul.f32 %v486_v49, %v402_v48 }
 0x112   : > { %v692_v53 = vclamps-f32 %v483_v51, 1.0 }
 0x113   : > { %524 = vmatmul.f32.vlgmr.msra.gmra.mxu1 %v488_v52 }
 0x114   : > { %v487_v55 = vadd.f32 1.0, %v692_v53 }
 0x116   : > { %v489_v56 = vmul.f32 %v487_v55, %v403_v54 }
 0x118   : > { %527 = vmatmul.f32.vlgmr.msra.gmra.mxu3 %v489_v56 }
 0x190   : > { %v525_v58 = vpop.f32.mrf.mxu1 }
 0x191   : > { %v531_v59 = vadd.f32 %v525_v58, %v490_v57 }
 0x193   : > { %533 = vst [vmem:[#allocation10] sm:$0xff] %v531_v59 }
 0x19a   : > { %538 = sbr.rel (%p693_p2) target bundleno = 425 (0x1a9), region = 64 }
 0x19b   : > { %v528_v60 = vpop.f32.mrf.mxu3 }
 0x19c   : > { %v532_v61 = vadd.f32 %v528_v60, %v491_v39 }
 0x19e   : > { %534 = vst [vmem:[#allocation10 + $0x8] sm:$0xff] %v532_v61 }
 0x19f   : > { %v539_v27 = vld [vmem:[#allocation10] sm:$0xff]  ;;  %v825_v62 = vld [vmem:[%s1315_s4] ss:$0 sm:$0xff] }
 0x1a0   : > { %v545_v63 = vadd.f32 %v825_v62, %v539_v27 }
 0x1a2   : > { %547 = vst [vmem:[#allocation10] sm:$0xff] %v545_v63 }
 0x1a5   : > { %v540_v36 = vld [vmem:[#allocation10 + $0x8] sm:$0xff] }
 0x1a6   : > { %v546_v0 = vadd.f32 %v825_v62, %v540_v36 }
 0x1a8   : > { %548 = vst [vmem:[#allocation10 + $0x8] sm:$0xff] %v546_v0 }
 0x1a9 PF: > { %p762_p3 = scmp.eq.s32.totalorder %s1148_s27, 3  ;;  %s559_s9 = sshll.u32 %s1316_s5, 4  ;;  %s560_s9 = int_to_ptr.hbm [resolvable:$true] %s559_s9 }
 0x1aa   : > { %s1043_s10 = smov [#allocation10]   ;;  %s1044_s16 = smov 128  }
 0x1ab   : > { %s557_s21 = sshll.u32 %s1043_s10, 4  ;;  %s1045_s28 = smov 8   ;;  %s558_s21 = int_to_ptr.vmem [resolvable:$true] %s557_s21 }
 0x1ac   : > { %742 = dma.vmem_to_hbm [thread:$0]  (%p762_p3), %s558_s21, 256, %s560_s9, [#allocation4], %s1044_s16, %s1044_s16, %s1045_s28  }
 0x1ad   : > { %1011 = dma.done.wait (%p762_p3), [#allocation4], 256  }
 0x1ae   : > { %1013 = vsyncadd (%p762_p3), [#allocation4], 4294967040 }
 0x1af PF: > { %s23_s23 = sadd.s32 1, %s1036_s23   ;;  %s1329_s27 = sld [smem:[#allocation15_spill]] }
 0x1b0   : > { %p20_p4 = scmp.ge.s32.totalorder %s23_s23, 6   ;;  %s1330_s18 = smov %s1020_s19 }
 0x1b1   : > { %s1331_s19 = smov %s1024_s20  ;;  %s1332_s20 = smov %s1125_s30 }
 0x1b2   : > { %s1333_s21 = smov %s1032_s22  ;;  %22 = sbr.rel (!%p20_p4) target bundleno = 12 (0xc), region = 116 }
 0x1b5   : > { %s1334_s22 = smov %s1329_s27 }
 0x1b7   :  { %576 = vsyncpa [#allocation3], 1 }
 0x1b8   :  { %578 = vsyncpa [#allocation3 + $0x1], 1 }
 0x1b9   :  { %579 = vsyncpa [#allocation6], 1 }
 0x1ba   :  { %581 = vsyncpa [#allocation6 + $0x1], 1 }
 0x1bb   :  { %582 = vsyncpa [#allocation9], 1 }
 0x1bc   :  { %584 = vsyncpa [#allocation9 + $0x1], 1 }
 0x1bd   :  { %585 = vsyncpa [#allocation4], 1 }
 0x1be   :  { %587 = vsyncpa [#allocation4 + $0x1], 1 }

</bundles_post_ra>
